<compile_context>
chip_gen: v7x
topology: tpu7x:2x2x1
jax: 0.10.0
libtpu: 0.0.40
codegen_flags: <defaults>
</compile_context>

<pallas_src>
import math
from functools import partial

import jax
import jax.numpy as jnp
from jax.experimental import pallas as pl
from jax.experimental.pallas import tpu as pltpu


# ----------------------------- Node (tree glue) -----------------------------
class Node:
    def __init__(self, label=None, span=None, children=None):
        self.label = label
        self.span = span
        self.children = children or []
        self.h = None
        self.c = None
        self.gates = None

    def is_leaf(self):
        return len(self.children) == 0

    def add_child(self, child):
        self.children.append(child)
        return self


# ------------------------------- Pallas kernel ------------------------------
def _tree_lstm_kernel(parent_ref, x_ref, w_ref, u_ref, b_ref,
                      out_ref, h_sc, c_sc, *, H):
    """One grid step = one tree node (nodes are ordered parent-before-child).

    parent_ref : SMEM int32 (num_nodes,)  -- parent state row (0 == zero row)
    x_ref      : VMEM (N_pad, d_in)       -- per-node input embeddings (resident)
    w_ref      : VMEM (d_in, 4H)          -- [W_i|W_o|W_u|W_f]          (resident)
    u_ref      : VMEM (H, 4H)             -- [U_i|U_o|U_u|U_f]          (resident)
    b_ref      : VMEM (1, 4H)             -- [b_i|b_o|b_u|b_f]          (resident)
    out_ref    : VMEM (N_pad, 6H)         -- packed [h|c|i|o|u|f]       (resident)
    h_sc, c_sc : VMEM (num_nodes+1, H)    -- carried hidden/cell state
    """
    n = pl.program_id(0)

    @pl.when(n == 0)
    def _init():
        # Row 0 of the state scratch acts as the root's (zero) parent state.
        h_sc[...] = jnp.zeros_like(h_sc)
        c_sc[...] = jnp.zeros_like(c_sc)
        out_ref[...] = jnp.zeros_like(out_ref)   # deterministic padded rows

    p = parent_ref[n]                            # parent state row (scalar)
    x = x_ref[pl.ds(n, 1), :]                    # (1, d_in)
    ph = h_sc[pl.ds(p, 1), :]                    # (1, H)
    pc = c_sc[pl.ds(p, 1), :]                    # (1, H)

    # Single fused pre-activation: (1, 4H)
    z = (jnp.dot(x, w_ref[...], preferred_element_type=jnp.float32)
         + jnp.dot(ph, u_ref[...], preferred_element_type=jnp.float32)
         + b_ref[...])

    i = jax.nn.sigmoid(z[:, 0:H])
    o = jax.nn.sigmoid(z[:, H:2 * H])
    u = jnp.tanh(z[:, 2 * H:3 * H])
    f = jax.nn.sigmoid(z[:, 3 * H:4 * H])

    c = i * u + f * pc
    h = o * jnp.tanh(c)

    # Carry state for children (this node's state lives at row n + 1).
    h_sc[pl.ds(n + 1, 1), :] = h
    c_sc[pl.ds(n + 1, 1), :] = c

    # One lane-dense packed store per node.
    out_ref[pl.ds(n, 1), :] = jnp.concatenate([h, c, i, o, u, f], axis=1)


def build_tree_kernel(num_nodes, n_pad, d_in, d_hidden):
    H = d_hidden
    grid_spec = pltpu.PrefetchScalarGridSpec(
        num_scalar_prefetch=1,                 # parent index table -> SMEM
        grid=(num_nodes,),
        in_specs=[
            pl.BlockSpec((n_pad, d_in), lambda n, parents: (0, 0)),   # x_all
            pl.BlockSpec((d_in, 4 * H), lambda n, parents: (0, 0)),   # W_all
            pl.BlockSpec((H, 4 * H), lambda n, parents: (0, 0)),      # U_all
            pl.BlockSpec((1, 4 * H), lambda n, parents: (0, 0)),      # b_all
        ],
        out_specs=pl.BlockSpec((n_pad, 6 * H), lambda n, parents: (0, 0)),
        scratch_shapes=[
            pltpu.VMEM((num_nodes + 1, H), jnp.float32),   # h state (+zero row)
            pltpu.VMEM((num_nodes + 1, H), jnp.float32),   # c state (+zero row)
        ],
    )
    fn = pl.pallas_call(
        partial(_tree_lstm_kernel, H=H),
        grid_spec=grid_spec,
        out_shape=jax.ShapeDtypeStruct((n_pad, 6 * H), jnp.float32),
        compiler_params=pltpu.CompilerParams(
            # Sequential data dependency (child needs parent state).
            dimension_semantics=("arbitrary",)),
    )
    return jax.jit(fn)


# ------------------------------ Parameter setup -----------------------------
def init_params(key, d_in, d_hidden):
    """Deterministic init mimicking PyTorch nn.Linear default (U(-1/sqrt(fan_in), ...))."""
    H = d_hidden
    ks = jax.random.split(key, 6)
    bi = 1.0 / math.sqrt(d_in)
    bh = 1.0 / math.sqrt(H)
    # PyTorch layout: weight (out, in), bias (out,)
    W_iou = jax.random.uniform(ks[0], (3 * H, d_in), jnp.float32, -bi, bi)
    b_iou = jax.random.uniform(ks[1], (3 * H,), jnp.float32, -bi, bi)
    U_iou = jax.random.uniform(ks[2], (3 * H, H), jnp.float32, -bh, bh)
    W_f = jax.random.uniform(ks[3], (H, d_in), jnp.float32, -bi, bi)
    b_f = jax.random.uniform(ks[4], (H,), jnp.float32, -bi, bi)
    U_f = jax.random.uniform(ks[5], (H, H), jnp.float32, -bh, bh)
    return dict(W_iou=W_iou, b_iou=b_iou, U_iou=U_iou, W_f=W_f, b_f=b_f, U_f=U_f)


def pack_kernel_params(p, d_hidden):
    """Fuse all gate weights into (in, 4H) layout: columns = [i | o | u | f]."""
    H = d_hidden
    W_iou, b_iou, U_iou = p["W_iou"], p["b_iou"], p["U_iou"]
    W_all = jnp.concatenate(
        [W_iou[0:H].T, W_iou[H:2 * H].T, W_iou[2 * H:3 * H].T, p["W_f"].T], axis=1)
    U_all = jnp.concatenate(
        [U_iou[0:H].T, U_iou[H:2 * H].T, U_iou[2 * H:3 * H].T, p["U_f"].T], axis=1)
    b_all = jnp.concatenate(
        [b_iou[0:H], b_iou[H:2 * H], b_iou[2 * H:3 * H], p["b_f"]]).reshape(1, 4 * H)
    return W_all, U_all, b_all


# ------------------------------ Tree traversal ------------------------------
def linearize_tree(root):
    """Pre-order DFS: parent always precedes its children. Node k's h/c state
    row is k+1; row 0 is the implicit zero state used by the root."""
    nodes, parent_row = [], []

    def visit(node, prow):
        idx = len(nodes)
        nodes.append(node)
        parent_row.append(prow)
        for child in node.children:
            visit(child, idx + 1)

    visit(root, 0)
    return nodes, jnp.asarray(parent_row, dtype=jnp.int32)


def build_inputs(nodes, vec_lookup, d_in, n_pad):
    rows = []
    for node in nodes:
        tok = node.span[0]
        if tok in vec_lookup:
            rows.append(jnp.asarray(vec_lookup[tok], jnp.float32).reshape(d_in))
        else:
            # PyTorch uses zeros(d_hidden) here; d_in == d_hidden in this model.
            rows.append(jnp.zeros((d_in,), jnp.float32))
    while len(rows) < n_pad:
        rows.append(jnp.zeros((d_in,), jnp.float32))
    return jnp.stack(rows, axis=0)


def tree_forward(root, vec_lookup, params, d_in, d_hidden):
    """Replicates TopDownTreeLSTMWithGates.forward with a single whole-tree kernel."""
    nodes, parent_idx = linearize_tree(root)
    num_nodes = len(nodes)
    n_pad = ((num_nodes + 7) // 8) * 8
    x_all = build_inputs(nodes, vec_lookup, d_in, n_pad)
    W_all, U_all, b_all = pack_kernel_params(params, d_hidden)

    kernel = build_tree_kernel(num_nodes, n_pad, d_in, d_hidden)
    packed = kernel(parent_idx, x_all, W_all, U_all, b_all)
    packed = jax.block_until_ready(packed)

    H = d_hidden
    for k, node in enumerate(nodes):
        row = packed[k]
        h, c = row[0:H], row[H:2 * H]
        i, o = row[2 * H:3 * H], row[3 * H:4 * H]
        u, f = row[4 * H:5 * H], row[5 * H:6 * H]
        node.h, node.c = h, c
        node.h_tensor, node.c_tensor = h, c
        node.gates = {
            "i_gate": i,
            "o_gate": o,
            "u_gate": u,
            # Root (top-level call) reports f_gate = 0.5, like the reference.
            "f_gate": (jnp.ones_like(i) * 0.5) if k == 0 else f,
        }
    return nodes[0].h, nodes[0].c


# ------------------------- Pure-JAX reference (check) ------------------------
def ref_node(x, ph, pc, p, H):
    iou = p["W_iou"] @ x + p["b_iou"]
    if ph is not None:
        iou = iou + p["U_iou"] @ ph
    i = jax.nn.sigmoid(iou[0:H])
    o = jax.nn.sigmoid(iou[H:2 * H])
    u = jnp.tanh(iou[2 * H:3 * H])
    if ph is None:
        f = jnp.ones((H,), jnp.float32) * 0.5
        c = i * u
    else:
        f = jax.nn.sigmoid(p["W_f"] @ x + p["b_f"] + p["U_f"] @ ph)
        c = i * u + f * pc
    h = o * jnp.tanh(c)
    return h, c, i, o, u, f


def ref_tree(node, vec_lookup, p, d_hidden, parent_h=None, parent_c=None, out=None):
    tok = node.span[0]
    x = vec_lookup.get(tok, jnp.zeros((d_hidden,), jnp.float32))
    h, c, i, o, u, f = ref_node(x, parent_h, parent_c, p, d_hidden)
    out.append((node, h, c, i, o, u, f))
    for child in node.children:
        ref_tree(child, vec_lookup, p, d_hidden, h, c, out)
    return h, c


# ----------------------------------- Main ------------------------------------
if __name__ == "__main__":
    d_in = 32
    d_hidden = 32

    key = jax.random.PRNGKey(0)
    pkey, ekey = jax.random.split(key)
    params = init_params(pkey, d_in, d_hidden)

    # Small tree over a 4-token "sentence"; token 3 is deliberately missing
    # from vec_lookup to exercise the zero-embedding branch.
    root = Node("S", (0, 4))
    np_ = Node("NP", (0, 2))
    vp_ = Node("VP", (2, 4))
    root.add_child(np_).add_child(vp_)
    np_.add_child(Node("DT", (0, 1))).add_child(Node("NN", (1, 2)))
    vp_.add_child(Node("VB", (2, 3))).add_child(Node("NN", (3, 4)))

    embs = jax.random.normal(ekey, (3, d_in), jnp.float32)
    vec_lookup = {t: embs[t] for t in range(3)}  # token 3 intentionally absent

    h, c = tree_forward(root, vec_lookup, params, d_in, d_hidden)
    jax.block_until_ready((h, c))

    # Correctness check against a pure-JAX reference of the PyTorch semantics.
    ref_out = []
    ref_tree(root, vec_lookup, params, d_hidden, out=ref_out)
    for node, rh, rc, ri, ro, ru, rf in ref_out:
        assert jnp.allclose(node.h, rh, atol=1e-4), node.label
        assert jnp.allclose(node.c, rc, atol=1e-4), node.label
        assert jnp.allclose(node.gates["i_gate"], ri, atol=1e-4), node.label
        assert jnp.allclose(node.gates["o_gate"], ro, atol=1e-4), node.label
        assert jnp.allclose(node.gates["u_gate"], ru, atol=1e-4), node.label
        assert jnp.allclose(node.gates["f_gate"], rf, atol=1e-4), node.label

    print("KERNEL_OK")
</pallas_src>

<mosaic_0001>
module attributes {stable_mosaic.version = 11 : i64} {
  func.func @_tree_lstm_kernel(%arg0: i32, %arg1: memref<7xi32, #tpu.memory_space<smem>>, %arg2: memref<8x32xf32, #tpu.memory_space<vmem>>, %arg3: memref<32x128xf32, #tpu.memory_space<vmem>>, %arg4: memref<32x128xf32, #tpu.memory_space<vmem>>, %arg5: memref<1x128xf32, #tpu.memory_space<vmem>>, %arg6: memref<8x192xf32, #tpu.memory_space<vmem>>, %arg7: memref<8x32xf32, #tpu.memory_space<vmem>>, %arg8: memref<8x32xf32, #tpu.memory_space<vmem>>) attributes {dimension_semantics = [#tpu.dimension_semantics<arbitrary>], iteration_bounds = array<i64: 7>, scalar_prefetch = 1 : i64, scratch_operands = 2 : i64, tpu.core_type = #tpu.core_type<tc>, window_params = [{pipeline_mode = #tpu.pipeline_mode<synchronous>, transform_indices = @transform_0, window_bounds = array<i64: 8, 32>}, {pipeline_mode = #tpu.pipeline_mode<synchronous>, transform_indices = @transform_1, window_bounds = array<i64: 32, 128>}, {pipeline_mode = #tpu.pipeline_mode<synchronous>, transform_indices = @transform_2, window_bounds = array<i64: 32, 128>}, {pipeline_mode = #tpu.pipeline_mode<synchronous>, transform_indices = @transform_3, window_bounds = array<i64: 1, 128>}, {pipeline_mode = #tpu.pipeline_mode<synchronous>, transform_indices = @transform_4, window_bounds = array<i64: 8, 192>}]} {
    %c0_i32 = arith.constant 0 : i32
    %0 = arith.cmpi eq, %arg0, %c0_i32 : i32
    %1 = arith.extui %0 : i1 to i32
    %c0_i32_0 = arith.constant 0 : i32
    %2 = arith.cmpi ne, %1, %c0_i32_0 : i32
    scf.if %2 {
      %cst_17 = arith.constant 0.000000e+00 : f32
      %52 = vector.broadcast %cst_17 : f32 to vector<8x32xf32>
      %c0_18 = arith.constant 0 : index
      %c0_19 = arith.constant 0 : index
      %53 = vector.load %arg7[%c0_18, %c0_19] : memref<8x32xf32, #tpu.memory_space<vmem>>, vector<8x32xf32>
      tpu.vector_store %arg7[%c0_18, %c0_19], %52 {strides = array<i32>} : memref<8x32xf32, #tpu.memory_space<vmem>>, vector<8x32xf32>,
      %cst_20 = arith.constant 0.000000e+00 : f32
      %54 = vector.broadcast %cst_20 : f32 to vector<8x32xf32>
      %c0_21 = arith.constant 0 : index
      %c0_22 = arith.constant 0 : index
      %55 = vector.load %arg8[%c0_21, %c0_22] : memref<8x32xf32, #tpu.memory_space<vmem>>, vector<8x32xf32>
      tpu.vector_store %arg8[%c0_21, %c0_22], %54 {strides = array<i32>} : memref<8x32xf32, #tpu.memory_space<vmem>>, vector<8x32xf32>,
      %cst_23 = arith.constant 0.000000e+00 : f32
      %56 = vector.broadcast %cst_23 : f32 to vector<8x192xf32>
      %c0_24 = arith.constant 0 : index
      %c0_25 = arith.constant 0 : index
      %57 = vector.load %arg6[%c0_24, %c0_25] : memref<8x192xf32, #tpu.memory_space<vmem>>, vector<8x192xf32>
      tpu.vector_store %arg6[%c0_24, %c0_25], %56 {strides = array<i32>} : memref<8x192xf32, #tpu.memory_space<vmem>>, vector<8x192xf32>,
    } else {
    }
    %3 = arith.index_cast %arg0 : i32 to index
    %4 = memref.load %arg1[%3] : memref<7xi32, #tpu.memory_space<smem>>
    %5 = arith.index_cast %arg0 : i32 to index
    %c0 = arith.constant 0 : index
    %6 = vector.load %arg2[%5, %c0] : memref<8x32xf32, #tpu.memory_space<vmem>>, vector<1x32xf32>
    %7 = arith.index_cast %4 : i32 to index
    %c0_1 = arith.constant 0 : index
    %8 = vector.load %arg7[%7, %c0_1] : memref<8x32xf32, #tpu.memory_space<vmem>>, vector<1x32xf32>
    %9 = arith.index_cast %4 : i32 to index
    %c0_2 = arith.constant 0 : index
    %10 = vector.load %arg8[%9, %c0_2] : memref<8x32xf32, #tpu.memory_space<vmem>>, vector<1x32xf32>
    %c0_3 = arith.constant 0 : index
    %c0_4 = arith.constant 0 : index
    %11 = vector.load %arg3[%c0_3, %c0_4] : memref<32x128xf32, #tpu.memory_space<vmem>>, vector<32x128xf32>
    %cst = arith.constant dense<0.000000e+00> : vector<1x128xf32>
    %12 = tpu.matmul %6, %11, %cst {dimension_numbers = #tpu.dot_dimension_numbers<[1], [0], [0], [1], [0, 0, 1, 1], [], []>} : vector<1x32xf32>, vector<32x128xf32>, vector<1x128xf32> -> vector<1x128xf32>
    %c0_5 = arith.constant 0 : index
    %c0_6 = arith.constant 0 : index
    %13 = vector.load %arg4[%c0_5, %c0_6] : memref<32x128xf32, #tpu.memory_space<vmem>>, vector<32x128xf32>
    %cst_7 = arith.constant dense<0.000000e+00> : vector<1x128xf32>
    %14 = tpu.matmul %8, %13, %cst_7 {dimension_numbers = #tpu.dot_dimension_numbers<[1], [0], [0], [1], [0, 0, 1, 1], [], []>} : vector<1x32xf32>, vector<32x128xf32>, vector<1x128xf32> -> vector<1x128xf32>
    %15 = arith.addf %12, %14 : vector<1x128xf32>
    %c0_8 = arith.constant 0 : index
    %c0_9 = arith.constant 0 : index
    %16 = vector.load %arg5[%c0_8, %c0_9] : memref<1x128xf32, #tpu.memory_space<vmem>>, vector<1x128xf32>
    %17 = arith.addf %15, %16 : vector<1x128xf32>
    %18 = vector.extract_strided_slice %17 {offsets = [0, 0], sizes = [1, 32], strides = [1, 1]} : vector<1x128xf32> to vector<1x32xf32>
    %19 = arith.negf %18 : vector<1x32xf32>
    %20 = math.exp %19 : vector<1x32xf32>
    %cst_10 = arith.constant 1.000000e+00 : f32
    %21 = vector.broadcast %cst_10 : f32 to vector<1x32xf32>
    %22 = arith.addf %21, %20 : vector<1x32xf32>
    %23 = arith.divf %21, %22 : vector<1x32xf32>
    %24 = vector.extract_strided_slice %17 {offsets = [0, 32], sizes = [1, 32], strides = [1, 1]} : vector<1x128xf32> to vector<1x32xf32>
    %25 = arith.negf %24 : vector<1x32xf32>
    %26 = math.exp %25 : vector<1x32xf32>
    %cst_11 = arith.constant 1.000000e+00 : f32
    %27 = vector.broadcast %cst_11 : f32 to vector<1x32xf32>
    %28 = arith.addf %27, %26 : vector<1x32xf32>
    %29 = arith.divf %27, %28 : vector<1x32xf32>
    %30 = vector.extract_strided_slice %17 {offsets = [0, 64], sizes = [1, 32], strides = [1, 1]} : vector<1x128xf32> to vector<1x32xf32>
    %31 = math.tanh %30 : vector<1x32xf32>
    %32 = vector.extract_strided_slice %17 {offsets = [0, 96], sizes = [1, 32], strides = [1, 1]} : vector<1x128xf32> to vector<1x32xf32>
    %33 = arith.negf %32 : vector<1x32xf32>
    %34 = math.exp %33 : vector<1x32xf32>
    %cst_12 = arith.constant 1.000000e+00 : f32
    %35 = vector.broadcast %cst_12 : f32 to vector<1x32xf32>
    %36 = arith.addf %35, %34 : vector<1x32xf32>
    %37 = arith.divf %35, %36 : vector<1x32xf32>
    %38 = arith.mulf %23, %31 : vector<1x32xf32>
    %39 = arith.mulf %37, %10 : vector<1x32xf32>
    %40 = arith.addf %38, %39 : vector<1x32xf32>
    %41 = math.tanh %40 : vector<1x32xf32>
    %42 = arith.mulf %29, %41 : vector<1x32xf32>
    %c1_i32 = arith.constant 1 : i32
    %43 = arith.addi %arg0, %c1_i32 : i32
    %44 = arith.index_cast %43 : i32 to index
    %c0_13 = arith.constant 0 : index
    %45 = vector.load %arg7[%44, %c0_13] : memref<8x32xf32, #tpu.memory_space<vmem>>, vector<1x32xf32>
    tpu.vector_store %arg7[%44, %c0_13], %42 {strides = array<i32>} : memref<8x32xf32, #tpu.memory_space<vmem>>, vector<1x32xf32>,
    %c1_i32_14 = arith.constant 1 : i32
    %46 = arith.addi %arg0, %c1_i32_14 : i32
    %47 = arith.index_cast %46 : i32 to index
    %c0_15 = arith.constant 0 : index
    %48 = vector.load %arg8[%47, %c0_15] : memref<8x32xf32, #tpu.memory_space<vmem>>, vector<1x32xf32>
    tpu.vector_store %arg8[%47, %c0_15], %40 {strides = array<i32>} : memref<8x32xf32, #tpu.memory_space<vmem>>, vector<1x32xf32>,
    %49 = tpu.concatenate %42, %40, %23, %29, %31, %37 in 1 : vector<1x32xf32>, vector<1x32xf32>, vector<1x32xf32>, vector<1x32xf32>, vector<1x32xf32>, vector<1x32xf32> -> vector<1x192xf32>
    %50 = arith.index_cast %arg0 : i32 to index
    %c0_16 = arith.constant 0 : index
    %51 = vector.load %arg6[%50, %c0_16] : memref<8x192xf32, #tpu.memory_space<vmem>>, vector<1x192xf32>
    tpu.vector_store %arg6[%50, %c0_16], %49 {strides = array<i32>} : memref<8x192xf32, #tpu.memory_space<vmem>>, vector<1x192xf32>,
    return
  }
  func.func @transform_0(%arg0: i32, %arg1: memref<7xi32, #tpu.memory_space<smem>>) -> (i32, i32) {
    %c0_i32 = arith.constant 0 : i32
    %c0_i32_0 = arith.constant 0 : i32
    %c0_i32_1 = arith.constant 0 : i32
    return %c0_i32, %c0_i32_0 : i32, i32
  }
  func.func @transform_1(%arg0: i32, %arg1: memref<7xi32, #tpu.memory_space<smem>>) -> (i32, i32) {
    %c0_i32 = arith.constant 0 : i32
    %c0_i32_0 = arith.constant 0 : i32
    %c0_i32_1 = arith.constant 0 : i32
    return %c0_i32, %c0_i32_0 : i32, i32
  }
  func.func @transform_2(%arg0: i32, %arg1: memref<7xi32, #tpu.memory_space<smem>>) -> (i32, i32) {
    %c0_i32 = arith.constant 0 : i32
    %c0_i32_0 = arith.constant 0 : i32
    %c0_i32_1 = arith.constant 0 : i32
    return %c0_i32, %c0_i32_0 : i32, i32
  }
  func.func @transform_3(%arg0: i32, %arg1: memref<7xi32, #tpu.memory_space<smem>>) -> (i32, i32) {
    %c0_i32 = arith.constant 0 : i32
    %c0_i32_0 = arith.constant 0 : i32
    %c0_i32_1 = arith.constant 0 : i32
    return %c0_i32, %c0_i32_0 : i32, i32
  }
  func.func @transform_4(%arg0: i32, %arg1: memref<7xi32, #tpu.memory_space<smem>>) -> (i32, i32) {
    %c0_i32 = arith.constant 0 : i32
    %c0_i32_0 = arith.constant 0 : i32
    %c0_i32_1 = arith.constant 0 : i32
    return %c0_i32, %c0_i32_0 : i32, i32
  }
}

</mosaic_0001>

<bundles_post_ra>
// kernel: tpu_custom_call.1
= control target key start
LH: loop header
LB: loop body
LE: loop exit
PB: predicated region body
PF: predicated region fallthrough
CT: control target
= control target key end

     0   :  { %s1054_s0 = inlined_call_operand.hbm [shape: s32[7], index: 0, kind: input, shape index: {}]   ;;  %s1055_s1 = inlined_call_operand.hbm [shape: f32[8,32], index: 1, kind: input, shape index: {}]   ;;  %s1056_s2 = inlined_call_operand.hbm [shape: f32[32,128], index: 2, kind: input, shape index: {}]   ;;  %s1057_s3 = inlined_call_operand.hbm [shape: f32[32,128], index: 3, kind: input, shape index: {}]   ;;  %s1058_s4 = inlined_call_operand.vmem [shape: f32[1,128], index: 4, kind: input, shape index: {}]   ;;  %s1059_s5 = inlined_call_operand.hbm [shape: f32[8,192], index: 5, kind: output, shape index: {}]  }
   0x1   :  { %s689_s20 = scalar_lea.hbm %s1054_s0, 16 }
   0x2   :  { %p690_p0 = scmp.ne.s32.totalorder %s1054_s0, %s689_s20  ;;  %p693_p1 = scmp.lt.u32.totalorder %s689_s20, %s1054_s0 }
   0x4   :  { %p695_p2 = pnand %p693_p1, %p690_p0 }
   0x6   :  { %698 = shalt.err (!%p695_p2)  }
   0x7   :  { %s831_s25 = smov [#allocation5]  }
   0x8   :  { %11 = dma.hbm_to_smem %s1054_s0, 16, %s831_s25, [#allocation4] }
   0x9   :  { %813 = dma.done.wait [#allocation4], 16 }
   0xa   :  { %814 = vsyncadd [#allocation4], 4294967280 }
   0xb   :  { %13 = sfence }
   0xc   :  { %14 = vsyncpa [#allocation7], 0 }
   0xd   :  { %15 = vsyncpa [#allocation10], 0 }
   0xe   :  { %16 = vsyncpa [#allocation8], 0  ;;  %s888_s28 = smov 0  }
   0xf LB: > { %s832_s29 = smov [#allocation9]   ;;  %s894_s6 = sadd.s32 4294967295, %s829_s28   ;;  %s829_s28 = sphi %s888_s28, %s22_s28  }
  0x10   : > { %s155_s30 = sshll.u32 %s832_s29, 4  ;;  %p545_p3 = scmp.ge.s32.totalorder %s829_s28, 1  ;;  %s904_s30 = int_to_ptr.vmem [resolvable:$true] %s155_s30 }
  0x11   : > { %p132_p4 = scmp.lt.s32.totalorder %s829_s28, 8  ;;  %p650_p6 = scmp.eq.s32.totalorder %s894_s6, 0 }
  0x12   : > { %s833_s7 = smov [#allocation6]   ;;  %s834_s10 = smov [#allocation11]  }
  0x13   : > { %p900_p7 = pnand %p545_p3, %p132_p4  ;;  %s145_s8 = sshll.u32 %s833_s7, 4  ;;  %s914_s8 = int_to_ptr.vmem [resolvable:$true] %s145_s8 }
  0x14   : > { %s168_s11 = sshll.u32 %s834_s10, 4  ;;  %s699_s14 = scalar_lea.hbm %s1056_s2, 512  ;;  %s916_s11 = int_to_ptr.vmem [resolvable:$true] %s168_s11 }
  0x15   : > { %p640_p8 = pneg %p900_p7  ;;  %p700_p10 = scmp.ne.s32.totalorder %s1056_s2, %s699_s14 }
  0x16   : > { %p706_p0 = scmp.lt.u32.totalorder %s699_s14, %s1056_s2 }
  0x17   : > { %p910_p9 = pnand %p650_p6, %p640_p8 }
  0x19   : > { %p926_p11 = pneg %p910_p9 }
  0x1b   : > { %p702_p12 = pnand %p926_p11, %p700_p10 }
  0x1d   : > { %p703_p13 = pneg %p702_p12 }
  0x1f   : > { %p708_p1 = pnand %p706_p0, %p703_p13 }
  0x21   : > { %711 = shalt.err (!%p708_p1)
}
  0x22   : > { %s712_s20 = scalar_lea.vmem %s904_s30, 512  ;;  %p720_p8 = scmp.lt.s32.totalorder %s904_s30, %s904_s30 }
  0x23   : > { %p713_p2 = scmp.ne.s32.totalorder %s904_s30, %s712_s20  ;;  %p721_p5 = scmp.lt.s32.totalorder %s712_s20, %s712_s20 }
  0x25   : > { %p715_p3 = pnand %p713_p2, %p926_p11  ;;  %p722_p10 = por %p721_p5, %p720_p8 }
  0x27   : > { %p716_p4 = pneg %p715_p3 }
  0x29   : > { %p723_p12 = pnand %p722_p10, %p716_p4 }
  0x2b   : > { %726 = shalt.err (!%p723_p12)
}
  0x2c   : > { %s835_s21 = smov 128   ;;  %s836_s22 = smov 8  }
  0x2d   : > { %646 = dma.hbm_to_vmem [thread:$0]  (!%p910_p9), %s1056_s2, 512, %s904_s30, [#allocation10], %s835_s21, %s835_s21, %s836_s22  }
  0x2e   : > { %s727_s27 = scalar_lea.hbm %s1055_s1, 128 }
  0x2f   : > { %p728_p5 = scmp.ne.s32.totalorder %s1055_s1, %s727_s27  ;;  %p734_p1 = scmp.lt.u32.totalorder %s727_s27, %s1055_s1 }
  0x31   : > { %p730_p13 = pnand %p728_p5, %p926_p11 }
  0x33   : > { %p731_p0 = pneg %p730_p13 }
  0x35   : > { %p736_p2 = pnand %p734_p1, %p731_p0 }
  0x37   : > { %739 = shalt.err (!%p736_p2)
}
  0x38   : > { %s740_s30 = scalar_lea.vmem %s914_s8, 128  ;;  %p748_p10 = scmp.lt.s32.totalorder %s914_s8, %s914_s8 }
  0x39   : > { %p741_p3 = scmp.ne.s32.totalorder %s914_s8, %s740_s30  ;;  %p749_p12 = scmp.lt.s32.totalorder %s740_s30, %s740_s30 }
  0x3b   : > { %p743_p4 = pnand %p741_p3, %p926_p11  ;;  %p750_p5 = por %p749_p12, %p748_p10 }
  0x3d   : > { %p744_p8 = pneg %p743_p4 }
  0x3f   : > { %p751_p13 = pnand %p750_p5, %p744_p8 }
  0x41   : > { %754 = shalt.err (!%p751_p13)
}
  0x42   : > { %643 = dma.hbm_to_vmem [thread:$0]  (!%p910_p9), %s1055_s1, 128, %s914_s8, [#allocation7]  }
  0x43   : > { %s755_s18 = scalar_lea.hbm %s1057_s3, 512 }
  0x44   : > { %p756_p0 = scmp.ne.s32.totalorder %s1057_s3, %s755_s18  ;;  %p762_p3 = scmp.lt.u32.totalorder %s755_s18, %s1057_s3 }
  0x46   : > { %p758_p1 = pnand %p756_p0, %p926_p11 }
  0x48   : > { %p759_p2 = pneg %p758_p1 }
  0x4a   : > { %p764_p4 = pnand %p762_p3, %p759_p2 }
  0x4c   : > { %767 = shalt.err (!%p764_p4)
}
  0x4d   : > { %s768_s8 = scalar_lea.vmem %s916_s11, 512  ;;  %p776_p5 = scmp.lt.s32.totalorder %s916_s11, %s916_s11 }
  0x4e   : > { %p769_p8 = scmp.ne.s32.totalorder %s916_s11, %s768_s8  ;;  %p777_p13 = scmp.lt.s32.totalorder %s768_s8, %s768_s8 }
  0x50   : > { %p771_p10 = pnand %p769_p8, %p926_p11  ;;  %p778_p0 = por %p777_p13, %p776_p5 }
  0x52   : > { %p772_p12 = pneg %p771_p10 }
  0x54   : > { %p779_p1 = pnand %p778_p0, %p772_p12 }
  0x56   : > { %782 = shalt.err (!%p779_p1)
}
  0x57   : > { %649 = dma.hbm_to_vmem [thread:$0]  (!%p910_p9), %s1057_s3, 512, %s916_s11, [#allocation10], %s835_s21, %s835_s21, %s836_s22  }
  0x58   : > { %187 = sbr.rel (%p900_p7) target bundleno = 749 (0x2ed), region = 36 }
  0x5f   : > { %816 = dma.done.wait (%p650_p6), [#allocation7], 128  }
  0x60   : > { %818 = vsyncadd (%p650_p6), [#allocation7], 4294967168 }
  0x61   : > { %820 = dma.done.wait (%p650_p6), [#allocation10], 1024  }
  0x62   : > { %822 = vsyncadd (%p650_p6), [#allocation10], 4294966272  ;;  %p1063_p11 = scmp.ne.s32.totalorder %s894_s6, 0 }
  0x63   : > { %vm215_vm0 = vcmask (!%p1063_p11), 261120   ;;  %vm219_vm1 = vcmask (!%p1063_p11), 523264   ;;  %v837_v0 = vmov (!%p1063_p11), 0.0  }
  0x64   : > { %214 = sbr.rel (%p1063_p11) target bundleno = 107 (0x6b), region = 52  ;;  %216 = vst.msk [vmem:[#allocation2] sm:$0xff] (!%p1063_p11), %vm215_vm0, %v837_v0  ;;  %217 = vst.msk [vmem:[#allocation3] sm:$0xff] (!%p1063_p11), %vm215_vm0, %v837_v0 }
  0x65   : > { %218 = vst [vmem:[#allocation12] sm:$0xff] (!%p1063_p11), %v837_v0  ;;  %220 = vst.msk [vmem:[#allocation12 + $0x8] sm:$0xff] (!%p1063_p11), %vm219_vm1, %v837_v0 }
  0x6b PF: > { %v232_v1 = vld [vmem:[#allocation11] sm:$0xff]  ;;  %v233_v2 = vld [vmem:[#allocation11 + $0x8] sm:$0xff]  ;;  %v838_v4 = vmov 0.0|0.0   ;;  %v234_v7 = vld [vmem:[#allocation11 + $0x10] sm:$0xff]  ;;  %s221_s0 = sld [smem:[#allocation5 + %s894_s6]]  ;;  %vm839_vm2 = vmmov 0   ;;  %v443_v41 = vlaneseq }
  0x6c   : > { %v228_v3 = vld [vmem:[#allocation9] sm:$0xff]  ;;  %612 = vmatprep.subr.bf16.mxu0 %v838_v4  ;;  %618 = vmatprep.subr.bf16.mxu1 %v838_v4  ;;  %v613_v5 = vpack.c.bf16 %v233_v2, %v232_v1  ;;  %v229_v6 = vld [vmem:[#allocation9 + $0x8] sm:$0xff]  ;;  %v235_v8 = vld [vmem:[#allocation11 + $0x18] sm:$0xff]  ;;  %v840_v12 = vmov 0.0   ;;  %vm236_vm3 = vcmask 261120   ;;  %s568_s11 = scalar_lea.vmem [#allocation6], %s829_s28 }
  0x6d   : > { %v619_v9 = vpack.c.bf16 %v229_v6, %v228_v3  ;;  %v230_v10 = vld [vmem:[#allocation9 + $0x10] sm:$0xff]  ;;  %v231_v11 = vld [vmem:[#allocation9 + $0x18] sm:$0xff]  ;;  %598 = vmatprep.mubr.msk.f32.mxu0 %vm839_vm2, %v840_v12  ;;  %609 = vmatprep.mubr.msk.f32.mxu1 %vm839_vm2, %v840_v12  ;;  %v616_v13 = vpack.c.bf16 %v235_v8, %v234_v7  ;;  %v570_v16 = vld [vmem:[%s568_s11 - $0x1] sm:$0x1]  ;;  %s841_s21 = smov 96   ;;  %s842_s29 = smov 64  }
  0x6e   : > { %614 = vmatpush3.bf16.msra.mxu0 %v613_v5  ;;  %v622_v14 = vpack.c.bf16 %v231_v11, %v230_v10  ;;  %v383_v20 = vld [vmem:[%s1058_s4] sm:$0x1]  ;;  %s843_s7 = smov 32   ;;  %vm419_vm4 = vcmask 253952   ;;  %s575_s10 = scalar_lea.vmem [#allocation3], %s829_s28  ;;  %v444_v44 = vshrl.u32 %v443_v41, 7 }
  0x6f   : > { %620 = vmatpush3.bf16.msra.mxu1 %v619_v9  ;;  %615 = vmatprep.subr.bf16.mxu0 %v838_v4  ;;  %v844_v39 = vmov 1966171168   ;;  %s571_s12 = scalar_lea.vmem [#allocation2], %s829_s28  ;;  %s459_s30 = sshra.s32 %s894_s6, 3  ;;  %vm432_vm5 = vcmask 523264   ;;  %vm434_vm6 = vcmask 785408  }
  0x70   : > { %621 = vmatprep.subr.bf16.mxu1 %v838_v4  ;;  %v441_v40 = vunpack.c.l.s4 %v844_v39  ;;  %s462_s13 = sand.u32 7, %s894_s6  ;;  %s579_s14 = sshll.u32 %s459_s30, 4  ;;  %vm457_vm7 = vcmp.lt.s32.totalorder %v443_v41, 192 }
  0x71   : > { %s224_s9 = scalar_lea.vmem [#allocation2], %s221_s0  ;;  %s226_s17 = scalar_lea.vmem [#allocation3], %s221_s0 }
  0x72   : > { %617 = vmatpush3.bf16.msra.mxu0 %v616_v13  ;;  %v225_v15 = vld [vmem:[%s224_s9] sm:$0x1]  ;;  %v442_v43 = vunpack.c.0.s8 %v441_v40  ;;  %s465_s15 = sadd.s32 %s579_s14, %s462_s13  ;;  %s845_s16 = smov [#allocation12]  }
  0x73   : > { %623 = vmatpush3.bf16.msra.mxu1 %v622_v14  ;;  %v227_v17 = vld [vmem:[%s226_s17] sm:$0x1]  ;;  %s476_s18 = sshll.u32 %s845_s16, 4  ;;  %p656_p6 = scmp.eq.s32.totalorder %s894_s6, 6  ;;  %s477_s18 = int_to_ptr.vmem [resolvable:$true] %s476_s18 }
  0x74   : > { %398 = vrot.lane.b32.xlu0 %v227_v17, %s841_s21  ;;  %v445_v48 = vsub.s32 %v442_v43, %v444_v44  ;;  %s466_s19 = scalar_lea.vmem [#allocation12], %s465_s15  ;;  %s783_s20 = scalar_lea.vmem %s477_s18, 256 }
  0x75   : > { %599 = vmatmul.mubr.msk.f32.vlgmr.msra.gmra.mrb[0].mxu0 %vm236_vm3, %v225_v15  ;;  %p784_p7 = scmp.ne.s32.totalorder %s477_s18, %s783_s20  ;;  %p790_p3 = scmp.lt.s32.totalorder %s477_s18, %s477_s18 }
  0x76   : > { %610 = vmatmul.mubr.msk.f32.vlgmr.msra.gmra.mrb[0].mxu1 %vm236_vm3, %v570_v16  ;;  %p791_p4 = scmp.lt.s32.totalorder %s783_s20, %s783_s20 }
  0x77   : > { %p785_p9 = pnand %p784_p7, %p656_p6 }
  0x78   : > { %p792_p8 = por %p791_p4, %p790_p3 }
  0x79   : > { %p786_p2 = pneg %p785_p9 }
  0x7b   : > { %p793_p10 = pnand %p792_p8, %p786_p2 }
  0xe6   : > { %v399_v29 = vpop.permute.xlu0 %398 }
 0x148   : > { %v306_v18 = vpop.f32.mrb[0].mxu0 }
 0x149   : > { %v379_v19 = vpop.f32.mrb[0].mxu1  ;;  %v600_v21 = vpop.f32.mrb[1].mxu0 }
 0x14a   : > { %v380_v22 = vadd.f32 %v379_v19, %v306_v18  ;;  %v611_v23 = vpop.f32.mrb[1].mxu1 }
 0x14c   : > { %v384_v24 = vadd.f32 %v383_v20, %v380_v22 }
 0x14e   : > { %v557_v25 = vmul.f32 -1.442695, %v384_v24  ;;  %681 = vtanh.f32 %v384_v24 }
 0x150   : > { %683 = vpow2.f32 %v557_v25 }
 0x158   : > { %v682_v26 = vpop.eup %681 }
 0x159   : > { %393 = vrot.lane.b32.xlu0 %v682_v26, %s842_s29 }
 0x15a   : > { %v684_v27 = vpop.eup %683 }
 0x15b   : > { %v388_v28 = vadd.f32 1.0, %v684_v27 }
 0x15d   : > { %685 = vrcp.f32 %v388_v28 }
 0x167   : > { %v686_v30 = vpop.eup %685 }
 0x168   : > { %v401_v31 = vmul.f32 %v686_v30, %v399_v29 }
 0x16a   : > { %403 = vrot.lane.b32.xlu1 %v401_v31, %s843_s7 }
 0x1cb   : > { %v394_v32 = vpop.permute.xlu0 %393 }
 0x1cc   : > { %v396_v33 = vmul.f32 %v686_v30, %v394_v32 }
 0x1dc   : > { %v404_v34 = vpop.permute.xlu1 %403 }
 0x1dd   : > { %v406_v35 = vadd.f32 %v404_v34, %v396_v33 }
 0x1df   : > { %687 = vtanh.f32 %v406_v35  ;;  %578 = vst.msk [vmem:[%s575_s10] sm:$0x1] %vm419_vm4, %v406_v35 }
 0x1e9   : > { %v688_v36 = vpop.eup %687 }
 0x1ea   : > { %409 = vrot.lane.b32.xlu1 %v688_v36, %s843_s7 }
 0x1ee   : > { %424 = vrot.lane.b32.xlu1 %v406_v35, %s843_s7 }
 0x25c   : > { %v410_v37 = vpop.permute.xlu1 %409 }
 0x25d   : > { %v412_v38 = vmul.f32 %v686_v30, %v410_v37 }
 0x25f   : > { %415 = vrot.lane.b32.xlu0 %v412_v38, %s841_s21 }
 0x260   : > { %v425_v45 = vpop.permute.xlu1 %424 }
 0x263   : > { %428 = vrot.lane.b32.xlu0 %v686_v30, %s842_s29 }
 0x2d1   : > { %v416_v42 = vpop.permute.xlu0 %415 }
 0x2d2   : > { %574 = vst.msk [vmem:[%s571_s12] sm:$0x1] %vm419_vm4, %v416_v42  ;;  %v431_v46 = vsel %vm236_vm3, %v416_v42, %v425_v45 }
 0x2d5   : > { %v429_v47 = vpop.permute.xlu0 %428 }
 0x2d6   : > { %v433_v49 = vsel %vm432_vm5, %v431_v46, %v429_v47  ;;  %v436_v50 = vsel %vm236_vm3, %v394_v32, %v429_v47 }
 0x2d7   : > { %v435_v51 = vsel %vm434_vm6, %v433_v49, %v429_v47 }
 0x2d8   : > { %v439_v52 = vcombine.low %v435_v51, %v436_v50 }
 0x2da   : > { %v446_v53 = vrot.slane %v439_v52, %v445_v48 }
 0x2dc   : > { %v453_v54 = vrot.slane %v446_v53, %v445_v48 }
 0x2de   : > { %467 = vst.msk [vmem:[%s466_s19] ss:$8 sm:$0x3] %vm457_vm7, %v453_v54 }
 0x2df   : > { %796 = shalt.err (!%p793_p10)
}
 0x2e0   : > { %s797_s8 = scalar_lea.hbm %s1059_s5, 256 }
 0x2e1   : > { %p798_p12 = scmp.ne.s32.totalorder %s1059_s5, %s797_s8  ;;  %p803_p0 = scmp.lt.u32.totalorder %s797_s8, %s1059_s5 }
 0x2e3   : > { %p799_p5 = pnand %p798_p12, %p656_p6 }
 0x2e5   : > { %p800_p13 = pneg %p799_p5 }
 0x2e7   : > { %p805_p1 = pnand %p803_p0, %p800_p13 }
 0x2e9   : > { %808 = shalt.err (!%p805_p1)
}
 0x2ea   : > { %637 = dma.vmem_to_hbm [thread:$0]  (%p656_p6), %s477_s18, 256, %s1059_s5, [#allocation8]  }
 0x2eb   : > { %824 = dma.done.wait (%p656_p6), [#allocation8], 256  }
 0x2ec   : > { %826 = vsyncadd (%p656_p6), [#allocation8], 4294967040 }
 0x2ed PF: > { %s22_s28 = sadd.s32 1, %s829_s28  }
 0x2ee   : > { %p19_p11 = scmp.ge.s32.totalorder %s22_s28, 9  }
 0x2f0   :  { %21 = sbr.rel (!%p19_p11) target bundleno = 15 (0xf), region = 83 }
 0x2f7   :  { %489 = vsyncpa [#allocation7], 1 }
 0x2f8   :  { %491 = vsyncpa [#allocation7 + $0x1], 1 }
 0x2f9   :  { %492 = vsyncpa [#allocation10], 1 }
 0x2fa   :  { %493 = vsyncpa [#allocation8], 1 }
 0x2fb   :  { %495 = vsyncpa [#allocation8 + $0x1], 1 }

</bundles_post_ra>
